<compile_context>
chip_gen: v6e
topology: v6e:2x2x1
jax: 0.10.0
libtpu: 0.0.40
codegen_flags: <defaults>
</compile_context>

<pallas_src>
import functools

import jax
import jax.numpy as jnp
from jax import lax
from jax.experimental import pallas as pl
from jax.experimental.pallas import tpu as pltpu

LOG_STD_MAX = 2.0
LOG_STD_MIN = -5.0
# Folded affine: log_std = A_CONST * tanh(z) + C_CONST
A_CONST = 0.5 * (LOG_STD_MAX - LOG_STD_MIN)   # 3.5
C_CONST = LOG_STD_MIN + A_CONST               # -1.5

HIDDEN = 256


def actor_kernel(x_ref, w1_ref, b1_ref, w2_ref, b2_ref, wh_ref, bh_ref, out_ref,
                 *, n_actions, row_chunk):
    # Weights are already in the MXU compute dtype (bf16 by default); biases f32.
    w1 = w1_ref[...]
    w2 = w2_ref[...]
    wh = wh_ref[...]
    b1 = b1_ref[...]
    b2 = b2_ref[...]
    bh = bh_ref[...]
    cd = w1.dtype

    # Lane-select mask computed ONCE per grid step (hoisted out of the chunk loop).
    lane = lax.broadcasted_iota(jnp.int32, (1, out_ref.shape[1]), 1)
    is_log_std = lane >= n_actions

    n_chunks = x_ref.shape[0] // row_chunk

    def body(c, carry):
        r = pl.multiple_of(c * row_chunk, row_chunk)
        x = x_ref[pl.ds(r, row_chunk), :].astype(cd)

        # fc1 + ReLU (f32 accumulation / epilogue).
        h1 = jnp.dot(x, w1, preferred_element_type=jnp.float32) + b1
        h1 = jnp.maximum(h1, 0.0)

        # fc2 + ReLU.
        h2 = jnp.dot(h1.astype(cd), w2, preferred_element_type=jnp.float32) + b2
        h2 = jnp.maximum(h2, 0.0)

        # Fused head: lanes [0, A) = mean, [A, 2A) = log_std pre-activation,
        # remaining lanes are zero padding (sliced off in the wrapper).
        z = jnp.dot(h2.astype(cd), wh, preferred_element_type=jnp.float32) + bh

        # tanh runs on the otherwise-idle EUP slot; evaluating it over the whole
        # 128-lane slab is the minimum vreg granularity anyway.
        log_std = A_CONST * jnp.tanh(z) + C_CONST
        out_ref[pl.ds(r, row_chunk), :] = jnp.where(
            is_log_std, log_std, z).astype(out_ref.dtype)
        return carry

    lax.fori_loop(0, n_chunks, body, 0, unroll=True)


def prepare_actor_params(w1, b1, w2, b2, wm, bm, ws, bs,
                         compute_dtype=jnp.bfloat16):
    """One-time parameter prep: fuse the two heads into a single lane-dense slab
    and pre-cast the matmul operands to the MXU compute dtype."""
    A = wm.shape[1]
    head_cols = max(128, pl.cdiv(2 * A, 128) * 128)

    wh = jnp.zeros((HIDDEN, head_cols), jnp.float32)
    wh = wh.at[:, :A].set(wm).at[:, A:2 * A].set(ws)
    bh = jnp.zeros((1, head_cols), jnp.float32)
    bh = bh.at[:, :A].set(bm.reshape(1, -1)).at[:, A:2 * A].set(bs.reshape(1, -1))

    params = (
        jnp.asarray(w1, compute_dtype),
        jnp.asarray(b1, jnp.float32).reshape(1, -1),
        jnp.asarray(w2, compute_dtype),
        jnp.asarray(b2, jnp.float32).reshape(1, -1),
        jnp.asarray(wh, compute_dtype),
        bh,
    )
    return params, A


@functools.partial(jax.jit, static_argnames=("n_actions", "batch_tile"))
def actor_forward(x, params, *, n_actions, batch_tile=512):
    w1, b1, w2, b2, wh, bh = params
    B, n_obs = x.shape
    head_cols = wh.shape[1]
    A = n_actions

    # --- Batch tiling ---------------------------------------------------------
    # Small batches run as a single grid step; mid-size batches are split into 2
    # steps so the "parallel" axis can use both TensorCores on v7x; large batches
    # tile at batch_tile rows with the weights held resident in VMEM.
    if B <= batch_tile:
        if B > 256:
            tile_b = ((B + 1) // 2 + 7) // 8 * 8   # ~B/2, rounded up to 8 rows
        else:
            tile_b = B
    else:
        tile_b = batch_tile
    num_tiles = pl.cdiv(B, tile_b)
    b_pad = num_tiles * tile_b
    x_p = jnp.pad(x, ((0, b_pad - B), (0, 0))) if b_pad != B else x

    # Internal row chunking bounds vreg pressure for big tiles.
    row_chunk = 128 if (tile_b > 128 and tile_b % 128 == 0) else tile_b

    def resident(arr):
        return pl.BlockSpec(arr.shape, lambda i: (0, 0))

    in_specs = [
        pl.BlockSpec((tile_b, n_obs), lambda i: (i, 0)),   # x tiles over batch
        resident(w1), resident(b1),
        resident(w2), resident(b2),
        resident(wh), resident(bh),
    ]
    out_specs = pl.BlockSpec((tile_b, head_cols), lambda i: (i, 0))

    kernel = functools.partial(actor_kernel, n_actions=A, row_chunk=row_chunk)

    out = pl.pallas_call(
        kernel,
        out_shape=jax.ShapeDtypeStruct((b_pad, head_cols), jnp.float32),
        grid=(num_tiles,),
        in_specs=in_specs,
        out_specs=out_specs,
        compiler_params=pltpu.CompilerParams(
            dimension_semantics=("parallel",),
        ),
    )(x_p, w1, b1, w2, b2, wh, bh)

    mean = out[:B, :A]
    log_std = out[:B, A:2 * A]
    return mean, log_std


def init_linear_params(key, fan_in, fan_out):
    """Deterministic init mimicking nn.Linear default (uniform +-1/sqrt(fan_in))."""
    kw, kb = jax.random.split(key)
    bound = 1.0 / jnp.sqrt(float(fan_in))
    # Stored as [in, out] (transpose of PyTorch's [out, in]) so x @ W works directly.
    w = jax.random.uniform(kw, (fan_in, fan_out), jnp.float32, -bound, bound)
    b = jax.random.uniform(kb, (1, fan_out), jnp.float32, -bound, bound)
    return w, b


def reference_forward(x, w1, b1, w2, b2, wm, bm, ws, bs):
    h1 = jnp.maximum(x @ w1 + b1, 0.0)
    h2 = jnp.maximum(h1 @ w2 + b2, 0.0)
    mean = h2 @ wm + bm
    ls = jnp.tanh(h2 @ ws + bs)
    ls = LOG_STD_MIN + 0.5 * (LOG_STD_MAX - LOG_STD_MIN) * (ls + 1.0)
    return mean, ls


if __name__ == "__main__":
    # Small shapes consistent with the module: batch=2 observations of dim 8,
    # 4-dimensional action space, hidden width 256 (fixed by the module).
    batch = 2
    n_observations = 8
    n_actions = 4

    key = jax.random.PRNGKey(0)
    k_x, k1, k2, k3, k4 = jax.random.split(key, 5)

    x = jax.random.normal(k_x, (batch, n_observations), jnp.float32)

    w1, b1 = init_linear_params(k1, n_observations, HIDDEN)   # fc1
    w2, b2 = init_linear_params(k2, HIDDEN, HIDDEN)           # fc2
    wm, bm = init_linear_params(k3, HIDDEN, n_actions)        # fc_mean
    ws, bs = init_linear_params(k4, HIDDEN, n_actions)        # fc_log_std

    # TODO(synk): action_scale / action_bias and get_action's Normal sampling are
    # plain JAX buffer math outside forward() and are not part of this kernel.

    # One-time param prep (head fusion + bf16 cast) — hoisted out of the hot path.
    params_bf16, A = prepare_actor_params(w1, b1, w2, b2, wm, bm, ws, bs,
                                          compute_dtype=jnp.bfloat16)
    params_f32, _ = prepare_actor_params(w1, b1, w2, b2, wm, bm, ws, bs,
                                         compute_dtype=jnp.float32)

    mean_ref, log_std_ref = reference_forward(x, w1, b1, w2, b2, wm, bm, ws, bs)

    # Default (bf16 MXU operands, f32 accumulate) — RL small-batch hot path.
    mean, log_std = actor_forward(x, params_bf16, n_actions=A)
    jax.block_until_ready((mean, log_std))
    assert mean.shape == (batch, n_actions) and log_std.shape == (batch, n_actions)
    assert jnp.allclose(mean, mean_ref, atol=1e-1, rtol=1e-1)
    assert jnp.allclose(log_std, log_std_ref, atol=1e-1, rtol=1e-1)

    # f32 path for exactness.
    mean32, log_std32 = actor_forward(x, params_f32, n_actions=A)
    jax.block_until_ready((mean32, log_std32))
    assert jnp.allclose(mean32, mean_ref, atol=1e-5, rtol=1e-5)
    assert jnp.allclose(log_std32, log_std_ref, atol=1e-5, rtol=1e-5)

    # Mid batch: single-tile range split into 2 grid steps (v7x two-TC path).
    xm = jax.random.normal(jax.random.PRNGKey(1), (300, n_observations), jnp.float32)
    mm, lm = actor_forward(xm, params_bf16, n_actions=A)
    jax.block_until_ready((mm, lm))
    mm_ref, lm_ref = reference_forward(xm, w1, b1, w2, b2, wm, bm, ws, bs)
    assert jnp.allclose(mm, mm_ref, atol=1e-1, rtol=1e-1)
    assert jnp.allclose(lm, lm_ref, atol=1e-1, rtol=1e-1)

    # Large batch: gridded over 512-row tiles, 128-row internal chunks, ragged pad.
    xb = jax.random.normal(jax.random.PRNGKey(2), (1000, n_observations), jnp.float32)
    mb, lb = actor_forward(xb, params_bf16, n_actions=A)
    jax.block_until_ready((mb, lb))
    mb_ref, lb_ref = reference_forward(xb, w1, b1, w2, b2, wm, bm, ws, bs)
    assert jnp.allclose(mb, mb_ref, atol=1e-1, rtol=1e-1)
    assert jnp.allclose(lb, lb_ref, atol=1e-1, rtol=1e-1)

    print("KERNEL_OK")
</pallas_src>

<mosaic_0001>
module attributes {stable_mosaic.version = 11 : i64} {
  func.func @actor_kernel(%arg0: i32, %arg1: memref<2x8xf32, #tpu.memory_space<vmem>>, %arg2: memref<8x256xbf16, #tpu.memory_space<vmem>>, %arg3: memref<1x256xf32, #tpu.memory_space<vmem>>, %arg4: memref<256x256xbf16, #tpu.memory_space<vmem>>, %arg5: memref<1x256xf32, #tpu.memory_space<vmem>>, %arg6: memref<256x128xbf16, #tpu.memory_space<vmem>>, %arg7: memref<1x128xf32, #tpu.memory_space<vmem>>, %arg8: memref<2x128xf32, #tpu.memory_space<vmem>>) attributes {dimension_semantics = [#tpu.dimension_semantics<parallel>], iteration_bounds = array<i64: 1>, scalar_prefetch = 0 : i64, scratch_operands = 0 : i64, tpu.core_type = #tpu.core_type<tc>, window_params = [{transform_indices = @transform_0, window_bounds = array<i64: 2, 8>}, {pipeline_mode = #tpu.pipeline_mode<synchronous>, transform_indices = @transform_1, window_bounds = array<i64: 8, 256>}, {pipeline_mode = #tpu.pipeline_mode<synchronous>, transform_indices = @transform_2, window_bounds = array<i64: 1, 256>}, {pipeline_mode = #tpu.pipeline_mode<synchronous>, transform_indices = @transform_3, window_bounds = array<i64: 256, 256>}, {pipeline_mode = #tpu.pipeline_mode<synchronous>, transform_indices = @transform_4, window_bounds = array<i64: 1, 256>}, {pipeline_mode = #tpu.pipeline_mode<synchronous>, transform_indices = @transform_5, window_bounds = array<i64: 256, 128>}, {pipeline_mode = #tpu.pipeline_mode<synchronous>, transform_indices = @transform_6, window_bounds = array<i64: 1, 128>}, {transform_indices = @transform_7, window_bounds = array<i64: 2, 128>}]} {
    %c0 = arith.constant 0 : index
    %c0_0 = arith.constant 0 : index
    %0 = vector.load %arg2[%c0, %c0_0] : memref<8x256xbf16, #tpu.memory_space<vmem>>, vector<8x256xbf16>
    %c0_1 = arith.constant 0 : index
    %c0_2 = arith.constant 0 : index
    %1 = vector.load %arg4[%c0_1, %c0_2] : memref<256x256xbf16, #tpu.memory_space<vmem>>, vector<256x256xbf16>
    %c0_3 = arith.constant 0 : index
    %c0_4 = arith.constant 0 : index
    %2 = vector.load %arg6[%c0_3, %c0_4] : memref<256x128xbf16, #tpu.memory_space<vmem>>, vector<256x128xbf16>
    %c0_5 = arith.constant 0 : index
    %c0_6 = arith.constant 0 : index
    %3 = vector.load %arg3[%c0_5, %c0_6] : memref<1x256xf32, #tpu.memory_space<vmem>>, vector<1x256xf32>
    %c0_7 = arith.constant 0 : index
    %c0_8 = arith.constant 0 : index
    %4 = vector.load %arg5[%c0_7, %c0_8] : memref<1x256xf32, #tpu.memory_space<vmem>>, vector<1x256xf32>
    %c0_9 = arith.constant 0 : index
    %c0_10 = arith.constant 0 : index
    %5 = vector.load %arg7[%c0_9, %c0_10] : memref<1x128xf32, #tpu.memory_space<vmem>>, vector<1x128xf32>
    %6 = tpu.iota {dimensions = array<i32: 1>} : vector<1x128xi32>
    %c4_i32 = arith.constant 4 : i32
    %7 = vector.broadcast %c4_i32 : i32 to vector<1x128xi32>
    %8 = arith.cmpi sge, %6, %7 : vector<1x128xi32>
    %c0_i32 = arith.constant 0 : i32
    %c2_i32 = arith.constant 2 : i32
    %9 = arith.muli %c0_i32, %c2_i32 : i32
    %10 = tpu.assume_multiple %9, 2 : i32
    %11 = arith.index_cast %10 : i32 to index
    %c0_11 = arith.constant 0 : index
    %12 = vector.load %arg1[%11, %c0_11] : memref<2x8xf32, #tpu.memory_space<vmem>>, vector<2x8xf32>
    %13 = arith.truncf %12 : vector<2x8xf32> to vector<2x8xbf16>
    %cst = arith.constant dense<0.000000e+00> : vector<2x256xf32>
    %14 = tpu.matmul %13, %0, %cst {dimension_numbers = #tpu.dot_dimension_numbers<[1], [0], [0], [1], [0, 0, 1, 1], [], []>} : vector<2x8xbf16>, vector<8x256xbf16>, vector<2x256xf32> -> vector<2x256xf32>
    %15 = vector.broadcast %3 : vector<1x256xf32> to vector<2x256xf32>
    %16 = arith.addf %14, %15 : vector<2x256xf32>
    %cst_12 = arith.constant 0.000000e+00 : f32
    %17 = vector.broadcast %cst_12 : f32 to vector<2x256xf32>
    %18 = arith.maximumf %16, %17 : vector<2x256xf32>
    %19 = arith.truncf %18 : vector<2x256xf32> to vector<2x256xbf16>
    %cst_13 = arith.constant dense<0.000000e+00> : vector<2x256xf32>
    %20 = tpu.matmul %19, %1, %cst_13 {dimension_numbers = #tpu.dot_dimension_numbers<[1], [0], [0], [1], [0, 0, 1, 1], [], []>} : vector<2x256xbf16>, vector<256x256xbf16>, vector<2x256xf32> -> vector<2x256xf32>
    %21 = vector.broadcast %4 : vector<1x256xf32> to vector<2x256xf32>
    %22 = arith.addf %20, %21 : vector<2x256xf32>
    %cst_14 = arith.constant 0.000000e+00 : f32
    %23 = vector.broadcast %cst_14 : f32 to vector<2x256xf32>
    %24 = arith.maximumf %22, %23 : vector<2x256xf32>
    %25 = arith.truncf %24 : vector<2x256xf32> to vector<2x256xbf16>
    %cst_15 = arith.constant dense<0.000000e+00> : vector<2x128xf32>
    %26 = tpu.matmul %25, %2, %cst_15 {dimension_numbers = #tpu.dot_dimension_numbers<[1], [0], [0], [1], [0, 0, 1, 1], [], []>} : vector<2x256xbf16>, vector<256x128xbf16>, vector<2x128xf32> -> vector<2x128xf32>
    %27 = vector.broadcast %5 : vector<1x128xf32> to vector<2x128xf32>
    %28 = arith.addf %26, %27 : vector<2x128xf32>
    %29 = math.tanh %28 : vector<2x128xf32>
    %cst_16 = arith.constant 3.500000e+00 : f32
    %30 = vector.broadcast %cst_16 : f32 to vector<2x128xf32>
    %31 = arith.mulf %30, %29 : vector<2x128xf32>
    %cst_17 = arith.constant -1.500000e+00 : f32
    %32 = vector.broadcast %cst_17 : f32 to vector<2x128xf32>
    %33 = arith.addf %31, %32 : vector<2x128xf32>
    %34 = vector.shape_cast %8 : vector<1x128xi1> to vector<1x128xi1>
    %35 = vector.broadcast %34 : vector<1x128xi1> to vector<2x128xi1>
    %36 = arith.select %35, %33, %28 : vector<2x128xi1>, vector<2x128xf32>
    %37 = arith.index_cast %10 : i32 to index
    %c0_18 = arith.constant 0 : index
    %38 = vector.load %arg8[%37, %c0_18] : memref<2x128xf32, #tpu.memory_space<vmem>>, vector<2x128xf32>
    tpu.vector_store %arg8[%37, %c0_18], %36 {strides = array<i32>} : memref<2x128xf32, #tpu.memory_space<vmem>>, vector<2x128xf32>,
    %c1_i32 = arith.constant 1 : i32
    return
  }
  func.func @transform_0(%arg0: i32) -> (i32, i32) {
    %c0_i32 = arith.constant 0 : i32
    %c0_i32_0 = arith.constant 0 : i32
    return %arg0, %c0_i32 : i32, i32
  }
  func.func @transform_1(%arg0: i32) -> (i32, i32) {
    %c0_i32 = arith.constant 0 : i32
    %c0_i32_0 = arith.constant 0 : i32
    %c0_i32_1 = arith.constant 0 : i32
    return %c0_i32, %c0_i32_0 : i32, i32
  }
  func.func @transform_2(%arg0: i32) -> (i32, i32) {
    %c0_i32 = arith.constant 0 : i32
    %c0_i32_0 = arith.constant 0 : i32
    %c0_i32_1 = arith.constant 0 : i32
    return %c0_i32, %c0_i32_0 : i32, i32
  }
  func.func @transform_3(%arg0: i32) -> (i32, i32) {
    %c0_i32 = arith.constant 0 : i32
    %c0_i32_0 = arith.constant 0 : i32
    %c0_i32_1 = arith.constant 0 : i32
    return %c0_i32, %c0_i32_0 : i32, i32
  }
  func.func @transform_4(%arg0: i32) -> (i32, i32) {
    %c0_i32 = arith.constant 0 : i32
    %c0_i32_0 = arith.constant 0 : i32
    %c0_i32_1 = arith.constant 0 : i32
    return %c0_i32, %c0_i32_0 : i32, i32
  }
  func.func @transform_5(%arg0: i32) -> (i32, i32) {
    %c0_i32 = arith.constant 0 : i32
    %c0_i32_0 = arith.constant 0 : i32
    %c0_i32_1 = arith.constant 0 : i32
    return %c0_i32, %c0_i32_0 : i32, i32
  }
  func.func @transform_6(%arg0: i32) -> (i32, i32) {
    %c0_i32 = arith.constant 0 : i32
    %c0_i32_0 = arith.constant 0 : i32
    %c0_i32_1 = arith.constant 0 : i32
    return %c0_i32, %c0_i32_0 : i32, i32
  }
  func.func @transform_7(%arg0: i32) -> (i32, i32) {
    %c0_i32 = arith.constant 0 : i32
    %c0_i32_0 = arith.constant 0 : i32
    return %arg0, %c0_i32 : i32, i32
  }
}

</mosaic_0001>

<bundles_post_ra>
// kernel: actor_forward.1
= control target key start
LH: loop header
LB: loop body
LE: loop exit
PB: predicated region body
PF: predicated region fallthrough
CT: control target
= control target key end

     0   :  { %12 = vsyncpa [#allocation3], 0  ;;  %s906_s0 = inlined_call_operand.hbm [shape: f32[2,8], index: 0, kind: input, shape index: {}]   ;;  %s907_s1 = inlined_call_operand.hbm [shape: bf16[8,256], index: 1, kind: input, shape index: {}]   ;;  %s908_s2 = inlined_call_operand.vmem [shape: f32[1,256], index: 2, kind: input, shape index: {}]   ;;  %s909_s3 = inlined_call_operand.hbm [shape: bf16[256,256], index: 3, kind: input, shape index: {}]   ;;  %s910_s4 = inlined_call_operand.vmem [shape: f32[1,256], index: 4, kind: input, shape index: {}]   ;;  %s911_s5 = inlined_call_operand.hbm [shape: bf16[256,128], index: 5, kind: input, shape index: {}]   ;;  %s912_s6 = inlined_call_operand.vmem [shape: f32[1,128], index: 6, kind: input, shape index: {}]   ;;  %s913_s7 = inlined_call_operand.vmem [shape: f32[2,128], index: 7, kind: output, shape index: {}]  }
   0x1   :  { %13 = vsyncpa [#allocation5], 0 }
   0x2   :  { %14 = vsyncpa [#allocation8], 0  ;;  %s833_s24 = smov [#allocation4]   ;;  %s834_s26 = smov [#allocation2]  }
   0x3   :  { %s31_s25 = sshll.u32 %s833_s24, 4  ;;  %s21_s27 = sshll.u32 %s834_s26, 4  ;;  %s32_s25 = int_to_ptr.vmem [resolvable:$true] %s31_s25  ;;  %s22_s27 = int_to_ptr.vmem [resolvable:$true] %s21_s27 }
   0x4   :  { %s755_s28 = scalar_lea.vmem %s32_s25, 128  ;;  %p760_p1 = scmp.lt.s32.totalorder %s32_s25, %s32_s25 }
   0x5   :  { %p756_p0 = scmp.ne.s32.totalorder %s32_s25, %s755_s28  ;;  %p761_p2 = scmp.lt.s32.totalorder %s755_s28, %s755_s28 }
   0x7   :  { %p762_p3 = por %p761_p2, %p760_p1 }
   0x9   :  { %p763_p4 = pnand %p762_p3, %p756_p0 }
   0xb   :  { %766 = shalt.err (!%p763_p4)
}
   0xc   :  { %34 = dma.hbm_to_vmem [thread:$0]  %s907_s1, 128, %s32_s25, [#allocation5]  }
   0xd   :  { %s775_s8 = scalar_lea.vmem %s22_s27, 32  ;;  %p780_p6 = scmp.lt.s32.totalorder %s22_s27, %s22_s27 }
   0xe   :  { %p776_p5 = scmp.ne.s32.totalorder %s22_s27, %s775_s8  ;;  %p781_p7 = scmp.lt.s32.totalorder %s775_s8, %s775_s8 }
  0x10   :  { %p782_p8 = por %p781_p7, %p780_p6 }
  0x12   :  { %p783_p9 = pnand %p782_p8, %p776_p5 }
  0x14   :  { %786 = shalt.err (!%p783_p9)
}
  0x15   :  { %24 = dma.hbm_to_vmem [thread:$0]  %s906_s0, 32, %s22_s27, [#allocation3]  }
  0x16   :  { %s835_s11 = smov [#allocation6]  }
  0x17   :  { %s42_s12 = sshll.u32 %s835_s11, 4  ;;  %s43_s12 = int_to_ptr.vmem [resolvable:$true] %s42_s12 }
  0x18   :  { %s795_s13 = scalar_lea.vmem %s43_s12, 4096  ;;  %p800_p11 = scmp.lt.s32.totalorder %s43_s12, %s43_s12 }
  0x19   :  { %p796_p10 = scmp.ne.s32.totalorder %s43_s12, %s795_s13  ;;  %p801_p12 = scmp.lt.s32.totalorder %s795_s13, %s795_s13 }
  0x1b   :  { %p802_p13 = por %p801_p12, %p800_p11 }
  0x1d   :  { %p803_p0 = pnand %p802_p13, %p796_p10 }
  0x1f   :  { %806 = shalt.err (!%p803_p0)
}
  0x20   :  { %s836_s1 = smov 128   ;;  %s837_s14 = smov 8  }
  0x21   :  { %48 = dma.hbm_to_vmem [thread:$0]  %s909_s3, 4096, %s43_s12, [#allocation5], %s836_s1, %s836_s1, %s837_s14  }
  0x22   :  { %s838_s17 = smov [#allocation7]  }
  0x23   :  { %s56_s18 = sshll.u32 %s838_s17, 4  ;;  %s57_s18 = int_to_ptr.vmem [resolvable:$true] %s56_s18 }
  0x24   :  { %s815_s0 = scalar_lea.vmem %s57_s18, 2048  ;;  %p820_p2 = scmp.lt.s32.totalorder %s57_s18, %s57_s18 }
  0x25   :  { %p816_p1 = scmp.ne.s32.totalorder %s57_s18, %s815_s0  ;;  %p821_p3 = scmp.lt.s32.totalorder %s815_s0, %s815_s0 }
  0x27   :  { %p822_p4 = por %p821_p3, %p820_p2 }
  0x29   :  { %p823_p5 = pnand %p822_p4, %p816_p1 }
  0x2b   :  { %826 = shalt.err (!%p823_p5)
}
  0x2c   :  { %s839_s19 = smov 64   ;;  %s840_s20 = smov 4  }
  0x2d   :  { %62 = dma.hbm_to_vmem [thread:$0]  %s911_s5, 2048, %s57_s18, [#allocation8], %s839_s19, %s839_s19, %s840_s20  }
  0x2e   :  { %827 = dma.done.wait [#allocation3], 32  }
  0x2f   :  { %828 = vsyncadd [#allocation3], 4294967264 }
  0x30   :  { %829 = dma.done.wait [#allocation5], 4224  }
  0x31   :  { %830 = vsyncadd [#allocation5], 4294963072 }
  0x32   :  { %831 = dma.done.wait [#allocation8], 2048  }
  0x33   :  { %832 = vsyncadd [#allocation8], 4294965248  ;;  %v841_v0 = vmov 0   ;;  %v78_v1 = vld [vmem:[#allocation4] sm:$0xff]  ;;  %vm171_vm0 = vcmask 1043456   ;;  %vm167_vm1 = vcmask 64512   ;;  %v146_v51 = vlaneseq }
  0x34   :  { %210 = vmatprep.mubr.bf16.mxu0 %v841_v0  ;;  %v149_v2 = vld [vmem:[#allocation2] sm:$0x3]  ;;  %v596_v3 = vcombine.high %v78_v1, %v78_v1  ;;  %v595_v4 = vcombine.low %v78_v1, %v78_v1  ;;  %v683_v6 = vld [vmem:[#allocation6 + $0x70] ss:$8 sps:$4 sm:$0xff]   ;;  %v684_v7 = vld [vmem:[#allocation6 + $0x64] ss:$8 sps:$4 sm:$0xff]  }
  0x35   :  { %v681_v5 = vld [vmem:[#allocation6 + $0x74] ss:$8 sps:$4 sm:$0xff]   ;;  %v150_v9 = vpack.c.bf16 %v149_v2, %v149_v2  ;;  %v686_v10 = vld [vmem:[#allocation6 + $0x60] ss:$8 sps:$4 sm:$0xff]   ;;  %v689_v12 = vld [vmem:[#allocation6 + $0x50] ss:$8 sps:$4 sm:$0xff]  }
  0x36   :  { %597 = vmatprep.subr.msk.bf16.mxu0 %vm171_vm0, %v596_v3  ;;  %v173_v8 = vsel %vm171_vm0, %v595_v4, 0  ;;  %394 = vmatprep.subr.bf16.mxu1 %v681_v5  ;;  %v687_v11 = vld [vmem:[#allocation6 + $0x54] ss:$8 sps:$4 sm:$0xff]   ;;  %v690_v13 = vld [vmem:[#allocation6 + $0x44] ss:$8 sps:$4 sm:$0xff]   ;;  %v153_v52 = vshrl.u32 %v146_v51, 7 }
  0x37   :  { %193 = vmatpush1.bf16.msra.mxu0 %v173_v8  ;;  %395 = vmatpush1.bf16.msra.mxu1 %v683_v6  ;;  %v692_v14 = vld [vmem:[#allocation6 + $0x40] ss:$8 sps:$4 sm:$0xff]   ;;  %v693_v15 = vld [vmem:[#allocation6 + $0x34] ss:$8 sps:$4 sm:$0xff]   ;;  %v695_v16 = vld [vmem:[#allocation6 + $0x30] ss:$8 sps:$4 sm:$0xff]  }
  0x38   :  { %396 = vmatprep.subr.bf16.mxu1 %v684_v7  ;;  %v696_v17 = vld [vmem:[#allocation6 + $0x24] ss:$8 sps:$4 sm:$0xff]   ;;  %v698_v18 = vld [vmem:[#allocation6 + $0x20] ss:$8 sps:$4 sm:$0xff]   ;;  %v699_v19 = vld [vmem:[#allocation6 + $0x14] ss:$8 sps:$4 sm:$0xff]  }
  0x39   :  { %v701_v20 = vld [vmem:[#allocation6 + $0x10] ss:$8 sps:$4 sm:$0xff]   ;;  %v702_v21 = vld [vmem:[#allocation6 + $0x4] ss:$8 sps:$4 sm:$0xff]   ;;  %v704_v22 = vld [vmem:[#allocation6] ss:$8 sps:$4 sm:$0xff]  }
  0x3a   :  { %598 = vmatmul.mubr.msk.bf16.vlgmr.msra.gmra.mxu0 %vm167_vm1, %v150_v9  ;;  %v705_v23 = vld [vmem:[#allocation6 + $0xf4] ss:$8 sps:$4 sm:$0xff]   ;;  %v707_v24 = vld [vmem:[#allocation6 + $0xf0] ss:$8 sps:$4 sm:$0xff]   ;;  %v708_v25 = vld [vmem:[#allocation6 + $0xe4] ss:$8 sps:$4 sm:$0xff]  }
  0x3b   :  { %397 = vmatpush1.bf16.msra.mxu1 %v686_v10  ;;  %v710_v26 = vld [vmem:[#allocation6 + $0xe0] ss:$8 sps:$4 sm:$0xff]   ;;  %v711_v27 = vld [vmem:[#allocation6 + $0xd4] ss:$8 sps:$4 sm:$0xff]   ;;  %v713_v28 = vld [vmem:[#allocation6 + $0xd0] ss:$8 sps:$4 sm:$0xff]  }
  0x3c   :  { %398 = vmatprep.subr.bf16.mxu1 %v687_v11  ;;  %v714_v29 = vld [vmem:[#allocation6 + $0xc4] ss:$8 sps:$4 sm:$0xff]   ;;  %v716_v30 = vld [vmem:[#allocation6 + $0xc0] ss:$8 sps:$4 sm:$0xff]   ;;  %v717_v31 = vld [vmem:[#allocation6 + $0xb4] ss:$8 sps:$4 sm:$0xff]  }
  0x3d   :  { %v719_v32 = vld [vmem:[#allocation6 + $0xb0] ss:$8 sps:$4 sm:$0xff]   ;;  %v720_v33 = vld [vmem:[#allocation6 + $0xa4] ss:$8 sps:$4 sm:$0xff]   ;;  %v722_v34 = vld [vmem:[#allocation6 + $0xa0] ss:$8 sps:$4 sm:$0xff]  }
  0x3e   :  { %v723_v35 = vld [vmem:[#allocation6 + $0x94] ss:$8 sps:$4 sm:$0xff]   ;;  %v725_v36 = vld [vmem:[#allocation6 + $0x90] ss:$8 sps:$4 sm:$0xff]   ;;  %v726_v37 = vld [vmem:[#allocation6 + $0x84] ss:$8 sps:$4 sm:$0xff]  }
  0x3f   :  { %399 = vmatpush1.bf16.msra.mxu1 %v689_v12  ;;  %v728_v38 = vld [vmem:[#allocation6 + $0x80] ss:$8 sps:$4 sm:$0xff]   ;;  %v729_v39 = vld [vmem:[#allocation7 + $0x78] sm:$0xff]   ;;  %v731_v41 = vld [vmem:[#allocation7 + $0x70] sm:$0xff]   ;;  %v154_v53 = vsub.s32 0, %v153_v52  ;;  %v158_v55 = vsub.s32 1, %v153_v52 }
  0x40   :  { %400 = vmatprep.subr.bf16.mxu1 %v690_v13  ;;  %v730_v40 = vld [vmem:[#allocation7 + $0x38] sm:$0xff]   ;;  %648 = vmatprep.subr.bf16.mxu0 %v729_v39  ;;  %v732_v42 = vld [vmem:[#allocation7 + $0x30] sm:$0xff]   ;;  %v733_v43 = vld [vmem:[#allocation7 + $0x68] sm:$0xff]  }
  0x41   :  { %649 = vmatpush3.bf16.msra.mxu0 %v730_v40  ;;  %v734_v44 = vld [vmem:[#allocation7 + $0x28] sm:$0xff]   ;;  %v735_v45 = vld [vmem:[#allocation7 + $0x60] sm:$0xff]   ;;  %v737_v47 = vld [vmem:[#allocation7 + $0x58] sm:$0xff]  }
  0x42   :  { %650 = vmatprep.subr.bf16.mxu0 %v731_v41  ;;  %v736_v46 = vld [vmem:[#allocation7 + $0x20] sm:$0xff]   ;;  %v738_v48 = vld [vmem:[#allocation7 + $0x18] sm:$0xff]   ;;  %v739_v49 = vld [vmem:[#allocation7 + $0x50] sm:$0xff]  }
  0x43   :  { %401 = vmatpush1.bf16.msra.mxu1 %v692_v14  ;;  %v740_v50 = vld [vmem:[#allocation7 + $0x10] sm:$0xff]   ;;  %v741_v4 = vld [vmem:[#allocation7 + $0x48] sm:$0xff]   ;;  %v743_v6 = vld [vmem:[#allocation7 + $0x40] sm:$0xff]  }
  0x44   :  { %402 = vmatprep.subr.bf16.mxu1 %v693_v15  ;;  %v143_v54 = vld [vmem:[%s908_s2] sm:$0x3]  ;;  %v742_v5 = vld [vmem:[#allocation7 + $0x8] sm:$0xff]   ;;  %v744_v7 = vld [vmem:[#allocation7] sm:$0xff]  }
  0x45   :  { %651 = vmatpush3.bf16.msra.mxu0 %v732_v42  ;;  %v155_v56 = vrot.slane %v143_v54, %v154_v53  ;;  %v159_v57 = vrot.slane %v143_v54, %v158_v55  ;;  %v144_v8 = vld [vmem:[%s910_s4] sm:$0x3] }
  0x46   :  { %652 = vmatprep.subr.bf16.mxu0 %v733_v43  ;;  %v227_v9 = vrot.slane %v144_v8, %v154_v53  ;;  %v231_v10 = vrot.slane %v144_v8, %v158_v55 }
  0x47   :  { %403 = vmatpush1.bf16.msra.mxu1 %v695_v16 }
  0x48   :  { %404 = vmatprep.subr.bf16.mxu1 %v696_v17 }
  0x49   :  { %653 = vmatpush3.bf16.msra.mxu0 %v734_v44 }
  0x4a   :  { %654 = vmatprep.subr.bf16.mxu0 %v735_v45 }
  0x4b   :  { %405 = vmatpush1.bf16.msra.mxu1 %v698_v18 }
  0x4c   :  { %406 = vmatprep.subr.bf16.mxu1 %v699_v19 }
  0x4d   :  { %655 = vmatpush3.bf16.msra.mxu0 %v736_v46 }
  0x4e   :  { %656 = vmatprep.subr.bf16.mxu0 %v737_v47 }
  0x4f   :  { %407 = vmatpush1.bf16.msra.mxu1 %v701_v20 }
  0x50   :  { %408 = vmatprep.subr.bf16.mxu1 %v702_v21 }
  0x51   :  { %657 = vmatpush3.bf16.msra.mxu0 %v738_v48 }
  0x52   :  { %658 = vmatprep.subr.bf16.mxu0 %v739_v49 }
  0x53   :  { %409 = vmatpush1.bf16.msra.mxu1 %v704_v22  ;;  %v631_v22 = vld [vmem:[%s912_s6] ss:$0 sm:$0xff] }
  0x54   :  { %410 = vmatprep.subr.bf16.mxu1 %v705_v23 }
  0x55   :  { %659 = vmatpush3.bf16.msra.mxu0 %v740_v50 }
  0x56   :  { %660 = vmatprep.subr.bf16.mxu0 %v741_v4 }
  0x57   :  { %411 = vmatpush2.bf16.msra.mxu1 %v707_v24 }
  0x58   :  { %412 = vmatprep.subr.bf16.mxu1 %v708_v25 }
  0x59   :  { %661 = vmatpush3.bf16.msra.mxu0 %v742_v5 }
  0x5a   :  { %662 = vmatprep.subr.bf16.mxu0 %v743_v6 }
  0x5b   :  { %413 = vmatpush2.bf16.msra.mxu1 %v710_v26 }
  0x5c   :  { %414 = vmatprep.subr.bf16.mxu1 %v711_v27 }
  0x5d   :  { %663 = vmatpush3.bf16.msra.mxu0 %v744_v7 }
  0x5f   :  { %415 = vmatpush2.bf16.msra.mxu1 %v713_v28  ;;  %v147_v28 = vand.u32 127, %v146_v51 }
  0x60   :  { %416 = vmatprep.subr.bf16.mxu1 %v714_v29 }
  0x61   :  { %vm148_vm2 = vcmp.ge.s32.totalorder %v147_v28, 4 }
  0x63   :  { %417 = vmatpush2.bf16.msra.mxu1 %v716_v30 }
  0x64   :  { %418 = vmatprep.subr.bf16.mxu1 %v717_v31 }
  0x67   :  { %419 = vmatpush2.bf16.msra.mxu1 %v719_v32 }
  0x68   :  { %420 = vmatprep.subr.bf16.mxu1 %v720_v33 }
  0x6b   :  { %421 = vmatpush2.bf16.msra.mxu1 %v722_v34 }
  0x6c   :  { %422 = vmatprep.subr.bf16.mxu1 %v723_v35 }
  0x6f   :  { %423 = vmatpush2.bf16.msra.mxu1 %v725_v36 }
  0x70   :  { %424 = vmatprep.subr.bf16.mxu1 %v726_v37 }
  0x73   :  { %425 = vmatpush2.bf16.msra.mxu1 %v728_v38 }
  0xfa   :  { %v212_v58 = vpop.f32.mrf.mxu0 }
  0xfb   :  { %v213_v59 = vadd.f32 %v212_v58, %v155_v56 }
  0xfc   :  { %v214_v60 = vpop.f32.mrf.mxu0 }
  0xfd   :  { %v215_v61 = vadd.f32 %v214_v60, %v159_v57  ;;  %v219_v62 = vmax.f32 %v213_v59, 0.0 }
  0xfe   :  { %v216_v63 = vpop.f32.mrf.mxu0 }
  0xff   :  { %v220_v0 = vmax.f32 %v215_v61, 0.0  ;;  %v221_v3 = vpack.c.bf16 %v219_v62, %v219_v62 }
 0x100   :  { %v217_v1 = vpop.f32.mrf.mxu0 }
 0x101   :  { %v222_v2 = vpack.c.bf16 %v220_v0, %v220_v0 }
 0x103   :  { %426 = vmatprep.mubr.bf16.mxu1 %v222_v2 }
 0x104   :  { %427 = vmatmul.mubr.bf16.vlgmr.msra.gmra.mxu1 %v221_v3 }
 0x1c4   :  { %v428_v11 = vpop.f32.mrf.mxu1 }
 0x1c5   :  { %v429_v12 = vadd.f32 %v428_v11, %v227_v9 }
 0x1c6   :  { %v430_v13 = vpop.f32.mrf.mxu1 }
 0x1c7   :  { %v431_v14 = vadd.f32 %v430_v13, %v231_v10  ;;  %v435_v15 = vmax.f32 %v429_v12, 0.0 }
 0x1c8   :  { %v432_v16 = vpop.f32.mrf.mxu1 }
 0x1c9   :  { %v436_v17 = vmax.f32 %v431_v14, 0.0  ;;  %v437_v20 = vpack.c.bf16 %v435_v15, %v435_v15 }
 0x1ca   :  { %v433_v18 = vpop.f32.mrf.mxu1 }
 0x1cb   :  { %v438_v19 = vpack.c.bf16 %v436_v17, %v436_v17 }
 0x1cd   :  { %573 = vmatprep.mubr.bf16.mxu0 %v438_v19 }
 0x1ce   :  { %574 = vmatmul.mubr.bf16.vlgmr.msra.gmra.mxu0 %v437_v20 }
 0x28e   :  { %v664_v21 = vpop.f32.mrf.mxu0 }
 0x290   :  { %v665_v23 = vpop.f32.mrf.mxu0 }
 0x291   :  { %v666_v24 = vadd.f32 %v665_v23, %v664_v21 }
 0x292   :  { %v667_v25 = vpop.f32.mrf.mxu0 }
 0x293   :  { %v576_v26 = vadd.f32 %v666_v24, %v631_v22 }
 0x294   :  { %v668_v27 = vpop.f32.mrf.mxu0 }
 0x295   :  { %745 = vtanh.f32 %v576_v26 }
 0x2a2   :  { %v746_v29 = vpop.eup %745 }
 0x2a3   :  { %v582_v30 = vmul.f32 3.5, %v746_v29 }
 0x2a5   :  { %v583_v31 = vadd.f32 -1.5, %v582_v30 }
 0x2a7   :  { %v586_v32 = vsel %vm148_vm2, %v583_v31, %v576_v26 }
 0x2a8   :  { %587 = vst [vmem:[%s913_s7] sm:$0x3] %v586_v32 }
 0x2a9   :  { %592 = vsyncpa [#allocation3], 1 }
 0x2aa   :  { %593 = vsyncpa [#allocation5], 1 }
 0x2ab   :  { %594 = vsyncpa [#allocation8], 1 }

</bundles_post_ra>
